<compile_context>
chip_gen: v7x
topology: tpu7x:2x2x1
jax: 0.10.0
libtpu: 0.0.40
codegen_flags: <defaults>
</compile_context>

<pallas_src>
import jax
import jax.numpy as jnp
import numpy as np
from jax.experimental import pallas as pl
from jax.experimental.pallas import tpu as pltpu


def build_pe(d_model: int, max_seq_length: int = 5000,
             dtype=jnp.float32) -> jnp.ndarray:
    """Deterministic sinusoidal positional-encoding table, shape (1, max_seq, d_model)."""
    position = np.arange(0, max_seq_length, dtype=np.float32)[:, None]          # (L, 1)
    div_term = np.exp(np.arange(0, d_model, 2, dtype=np.float32)
                      * (-np.log(10000.0) / d_model))                           # (ceil(D/2),)
    pe = np.zeros((max_seq_length, d_model), dtype=np.float32)
    pe[:, 0::2] = np.sin(position * div_term)
    pe[:, 1::2] = np.cos(position * div_term[: d_model // 2])                    # odd-D safe
    return jnp.asarray(pe, dtype=dtype)[None, :, :]                              # (1, L, D)


def _add_pe_kernel(x_ref, pe_ref, o_ref):
    # x_ref/o_ref: (TB, TS, W) tile; pe_ref: (1, TS, W) shared tile (broadcasts over TB).
    # Add in f32 (matches the torch f32 pe buffer), cast once on the store.
    x = x_ref[...].astype(jnp.float32)
    p = pe_ref[...].astype(jnp.float32)
    o_ref[...] = (x + p).astype(o_ref.dtype)


# Double-buffered (x, pe, out) tiles kept under ~24 MiB live (~4 MiB x-tiles):
# fine under v7x's 64 MiB physical, and made explicit for v5e via vmem_limit_bytes.
_LIVE_VMEM_TARGET = 24 << 20
_VMEM_LIMIT_BYTES = 40 << 20


def _sublane_align(itemsize: int) -> int:
    # f32 vregs pack (8,128); bf16/f16 pack (16,128); int8/fp8 pack (32,128).
    return {4: 8, 2: 16, 1: 32}.get(itemsize, 8)


def _largest_divisor_leq(n: int, cap: int) -> int:
    cap = max(1, min(n, cap))
    for d in range(cap, 0, -1):
        if n % d == 0:
            return d
    return 1


def positional_encoding(x: jnp.ndarray, pe: jnp.ndarray, *,
                        donate_x: bool = False,
                        max_live_bytes: int = _LIVE_VMEM_TARGET) -> jnp.ndarray:
    """x: (B, S, D); pe: (1, max_seq, D). Returns x + pe[:, :S] (in x.dtype)."""
    B, S, D = x.shape
    assert S <= pe.shape[1], "sequence longer than positional-encoding table"
    x_item = x.dtype.itemsize
    pe_item = pe.dtype.itemsize
    align = _sublane_align(x_item)

    # ---- choose a lane-dense (rows, W) view -----------------------------------
    if D % 128 == 0:
        # Natural layout is already lane-dense; pe rows are indexed straight out
        # of the full table by the BlockSpec (no wrapper-side slice/cast pass).
        rows, W = S, D
        x_view, pe_view = x, pe
        repacked = False
    else:
        flat = S * D
        W = next((c for c in range(2048, 0, -128) if flat % c == 0), 0)
        if W:
            rows = flat // W
            x_view = x.reshape(B, rows, W)
            pe_view = jax.lax.slice(pe, (0, 0, 0), (1, S, D)).reshape(1, rows, W)
            repacked = True
        else:
            # TODO(synk): S*D with no 128-multiple divisor -> masked partial stores;
            # split the 128-aligned bulk from the ragged tail for full lane-dense stores.
            rows, W = S, D
            x_view, pe_view = x, pe
            repacked = False

    # ---- tile sizing: biggest row/batch tile under the VMEM budget -------------
    per_row_bytes = W * (2 * x_item + pe_item)                    # x + out + pe per row
    budget_rows = max(1, max_live_bytes // (2 * per_row_bytes))   # /2: double-buffered

    if rows <= budget_rows:
        # Whole per-batch slab fits in one tile: batch TB sequences per grid step
        # to amortize the ~0.35 us per-step overhead on small slabs.
        ts = rows
        tb = _largest_divisor_leq(B, budget_rows // rows)
    else:
        ts = max(align, (min(budget_rows, rows) // align) * align)
        tb = 1

    # Guarantee >= 2 grid steps when possible so both v7x TensorCores get work.
    if pl.cdiv(rows, ts) * (B // tb) == 1:
        if B >= 2:
            tb = _largest_divisor_leq(B, B // 2)
        elif rows >= 2 * align:
            half = (rows + 1) // 2
            ts = ((half + align - 1) // align) * align

    n_tiles = pl.cdiv(rows, ts)
    n_bsteps = B // tb

    if (not repacked) and ts % 8 != 0:
        # Block sublane dim must either be 8-divisible or equal the full row dim;
        # for tiny non-aligned S materialize the (1, S, D) slice (cheap at this size).
        pe_view = jax.lax.slice(pe, (0, 0, 0), (1, S, D))

    # Row-tile axis OUTER, batch INNER: pe's block index depends only on the row
    # tile, so consecutive batch iterations reuse the resident pe tile.
    grid = (n_tiles, n_bsteps)

    extra_kwargs = {}
    if donate_x:
        # Only enable when the caller donates x (x dead after this op): reuses
        # x's HBM buffer for the output.
        extra_kwargs["input_output_aliases"] = {0: 0}

    out_view = pl.pallas_call(
        _add_pe_kernel,
        out_shape=jax.ShapeDtypeStruct((B, rows, W), x.dtype),
        grid_spec=pltpu.PrefetchScalarGridSpec(
            num_scalar_prefetch=0,
            grid=grid,
            in_specs=[
                pl.BlockSpec((tb, ts, W), lambda s, b: (b, s, 0)),   # x tile
                pl.BlockSpec((1, ts, W), lambda s, b: (0, s, 0)),    # shared pe tile
            ],
            out_specs=pl.BlockSpec((tb, ts, W), lambda s, b: (b, s, 0)),
        ),
        compiler_params=pltpu.CompilerParams(
            dimension_semantics=("parallel", "parallel"),
            vmem_limit_bytes=_VMEM_LIMIT_BYTES,
        ),
        cost_estimate=pl.CostEstimate(
            flops=B * S * D,
            transcendentals=0,
            bytes_accessed=2 * B * S * D * x_item + S * D * pe_item,
        ),
        **extra_kwargs,
    )(x_view, pe_view)

    return out_view.reshape(B, S, D)


if __name__ == "__main__":
    key = jax.random.PRNGKey(0)
    k1, k2, k3, k4 = jax.random.split(key, 4)
    max_seq = 64  # small synthetic table for the demo

    # Case 1: small non-128 d_model (lane-dense repack) + batched grid steps (TB=2).
    B, S, D = 4, 8, 32
    x = jax.random.normal(k1, (B, S, D), dtype=jnp.float32)
    pe = build_pe(D, max_seq)
    out = jax.block_until_ready(positional_encoding(x, pe))
    ref = x + pe[:, :S]
    np.testing.assert_allclose(np.asarray(out), np.asarray(ref), rtol=1e-6, atol=1e-6)

    # Case 2: 128-aligned d_model, pe rows indexed straight out of the full table.
    B2, S2, D2 = 2, 16, 128
    x2 = jax.random.normal(k2, (B2, S2, D2), dtype=jnp.float32)
    pe2 = build_pe(D2, max_seq)
    out2 = jax.block_until_ready(positional_encoding(x2, pe2))
    ref2 = x2 + pe2[:, :S2]
    np.testing.assert_allclose(np.asarray(out2), np.asarray(ref2), rtol=1e-6, atol=1e-6)

    # Case 3: ragged last row tile (S not a multiple of ts) via a tiny forced budget.
    B3, S3, D3 = 2, 36, 128
    x3 = jax.random.normal(k3, (B3, S3, D3), dtype=jnp.float32)
    pe3 = build_pe(D3, max_seq)
    out3 = jax.block_until_ready(positional_encoding(x3, pe3, max_live_bytes=98304))
    ref3 = x3 + pe3[:, :S3]
    np.testing.assert_allclose(np.asarray(out3), np.asarray(ref3), rtol=1e-6, atol=1e-6)

    # Case 4: bf16 activations -- no full-table cast; f32 add inside the kernel.
    B4, S4, D4 = 2, 16, 128
    x4 = jax.random.normal(k4, (B4, S4, D4), dtype=jnp.float32).astype(jnp.bfloat16)
    pe4 = build_pe(D4, max_seq)
    out4 = jax.block_until_ready(positional_encoding(x4, pe4))
    ref4 = (x4.astype(jnp.float32) + pe4[:, :S4]).astype(jnp.bfloat16)
    np.testing.assert_allclose(np.asarray(out4.astype(jnp.float32)),
                               np.asarray(ref4.astype(jnp.float32)),
                               rtol=1e-2, atol=1e-2)

    print("KERNEL_OK")
</pallas_src>

<mosaic_0001>
module attributes {stable_mosaic.version = 11 : i64} {
  func.func @_add_pe_kernel(%arg0: i32, %arg1: i32, %arg2: memref<2x1x256xf32, #tpu.memory_space<vmem>>, %arg3: memref<1x1x256xf32, #tpu.memory_space<vmem>>, %arg4: memref<2x1x256xf32, #tpu.memory_space<vmem>>) attributes {dimension_semantics = [#tpu.dimension_semantics<parallel>, #tpu.dimension_semantics<parallel>], iteration_bounds = array<i64: 1, 2>, scalar_prefetch = 0 : i64, scratch_operands = 0 : i64, tpu.core_type = #tpu.core_type<tc>, window_params = [{transform_indices = @transform_0, window_bounds = array<i64: 2, 1, 256>}, {transform_indices = @transform_1, window_bounds = array<i64: 1, 1, 256>}, {transform_indices = @transform_2, window_bounds = array<i64: 2, 1, 256>}]} {
    %c0 = arith.constant 0 : index
    %c0_0 = arith.constant 0 : index
    %c0_1 = arith.constant 0 : index
    %0 = vector.load %arg2[%c0, %c0_0, %c0_1] : memref<2x1x256xf32, #tpu.memory_space<vmem>>, vector<2x1x256xf32>
    %c0_2 = arith.constant 0 : index
    %c0_3 = arith.constant 0 : index
    %c0_4 = arith.constant 0 : index
    %1 = vector.load %arg3[%c0_2, %c0_3, %c0_4] : memref<1x1x256xf32, #tpu.memory_space<vmem>>, vector<1x1x256xf32>
    %2 = vector.broadcast %1 : vector<1x1x256xf32> to vector<2x1x256xf32>
    %3 = arith.addf %0, %2 : vector<2x1x256xf32>
    %c0_5 = arith.constant 0 : index
    %c0_6 = arith.constant 0 : index
    %c0_7 = arith.constant 0 : index
    %4 = vector.load %arg4[%c0_5, %c0_6, %c0_7] : memref<2x1x256xf32, #tpu.memory_space<vmem>>, vector<2x1x256xf32>
    tpu.vector_store %arg4[%c0_5, %c0_6, %c0_7], %3 {strides = array<i32>} : memref<2x1x256xf32, #tpu.memory_space<vmem>>, vector<2x1x256xf32>,
    return
  }
  func.func @transform_0(%arg0: i32, %arg1: i32) -> (i32, i32, i32) {
    %c0_i32 = arith.constant 0 : i32
    %c0_i32_0 = arith.constant 0 : i32
    return %arg1, %arg0, %c0_i32 : i32, i32, i32
  }
  func.func @transform_1(%arg0: i32, %arg1: i32) -> (i32, i32, i32) {
    %c0_i32 = arith.constant 0 : i32
    %c0_i32_0 = arith.constant 0 : i32
    %c0_i32_1 = arith.constant 0 : i32
    return %c0_i32, %arg0, %c0_i32_0 : i32, i32, i32
  }
  func.func @transform_2(%arg0: i32, %arg1: i32) -> (i32, i32, i32) {
    %c0_i32 = arith.constant 0 : i32
    %c0_i32_0 = arith.constant 0 : i32
    return %arg1, %arg0, %c0_i32 : i32, i32, i32
  }
}

</mosaic_0001>

<bundles_post_ra>
// kernel: tpu_custom_call.1
= control target key start
LH: loop header
LB: loop body
LE: loop exit
PB: predicated region body
PF: predicated region fallthrough
CT: control target
= control target key end

     0   :  { %7 = vsyncpa [#allocation3], 0  ;;  %s731_s0 = inlined_call_operand.hbm [shape: f32[4,1,256], index: 0, kind: input, shape index: {}]   ;;  %s732_s1 = inlined_call_operand.vmem [shape: f32[1,1,256], index: 1, kind: input, shape index: {}]   ;;  %s733_s2 = inlined_call_operand.hbm [shape: f32[4,1,256], index: 2, kind: output, shape index: {}]  }
   0x1   :  { %9 = vsyncpa [#allocation3 + $0x1], 0 }
   0x2   :  { %10 = vsyncpa [#allocation4], 0 }
   0x3   :  { %12 = vsyncpa [#allocation4 + $0x1], 0  ;;  %s553_s9 = smov 0   ;;  %s555_s10 = smov 0  }
   0x4   :  { %s557_s11 = smov 0   ;;  %s559_s12 = smov 0  }
   0x5   :  { %s561_s13 = smov 0   ;;  %s563_s14 = smov 0  }
   0x6 LB: > { %s330_s15 = sadd.s32 4294967295, %s530_s14   ;;  %s331_s16 = sadd.s32 4294967294, %s530_s14   ;;  %s530_s14 = sphi %s563_s14, %s18_s14   ;;  %s526_s13 = sphi %s561_s13, %s748_s13   ;;  %s522_s12 = sphi %s559_s12, %s747_s12   ;;  %s518_s11 = sphi %s557_s11, %s746_s11   ;;  %s514_s10 = sphi %s555_s10, %s745_s10   ;;  %s510_s9 = sphi %s553_s9, %s744_s9  }
   0x7   : > { %s27_s17 = sadd.s32 1, %s526_s13  ;;  %s39_s18 = sadd.s32 1, %s518_s11 }
   0x8   : > { %p28_p0 = scmp.ge.s32.totalorder %s27_s17, 2  ;;  %p46_p1 = scmp.ne.s32.totalorder %s518_s11, %s514_s10 }
   0x9   : > { %p47_p2 = scmp.eq.s32.totalorder %s530_s14, 0  ;;  %p52_p3 = scmp.ne.s32.totalorder %s514_s10, %s510_s9 }
   0xa   : > { %s750_s17 = smov (%p28_p0, %s27_s17), 0  ;;  %p53_p5 = scmp.eq.s32.totalorder %s330_s15, 0 }
   0xb   : > { %p594_p4 = por %p47_p2, %p46_p1  ;;  %s34_s20 = ssub.s32 %s526_s13, %s750_s17 }
   0xc   : > { %p104_p6 = scmp.eq.s32.totalorder %s330_s15, 1  ;;  %p37_p7 = scmp.eq.s32.totalorder %s34_s20, 0 }
   0xd   : > { %p600_p8 = por %p53_p5, %p52_p3  ;;  %p110_p10 = scmp.eq.s32.totalorder %s331_s16, 1 }
   0xe   : > { %p604_p9 = por %p104_p6, %p46_p1  ;;  %p364_p13 = scmp.lt.s32.totalorder %s530_s14, 2 }
   0xf   : > { %s609_s23 = scalar_select %p37_p7, %s518_s11, %s39_s18  }
  0x10   : > { %s737_s22 = scalar_select %p604_p9, 1, 0 }
  0x11   : > { %p611_p11 = por %p110_p10, %p52_p3  ;;  %s137_s25 = sand.u32 1, %s518_s11  }
  0x12   : > { %s335_s26 = sshll.u32 %s137_s25, 2  ;;  %s349_s27 = sshll.u32 %s526_s13, 6 }
  0x13   : > { %s738_s24 = scalar_select %p611_p11, 1, 0 }
  0x14   : > { %s622_s30 = scalar_lea.hbm %s731_s0, %s349_s27  ;;  %s141_s3 = scalar_lea.vmem [#allocation2], %s335_s26 }
  0x15   : > { %s151_s4 = sshll.u32 %s141_s3, 4  ;;  %p628_p0 = pnand %p364_p13, %p594_p4  ;;  %s624_s4 = int_to_ptr.vmem [resolvable:$true] %s151_s4 }
  0x16   : > { %s633_s6 = scalar_lea.sflag [#allocation3], %s137_s25  ;;  %s418_s7 = scalar_lea.hbm %s622_s30, 64 }
  0x17   : > { %p419_p2 = scmp.ne.s32.totalorder %s622_s30, %s418_s7  ;;  %p420_p3 = pneg %p628_p0 }
  0x18   : > { %s423_s16 = scalar_lea.hbm %s731_s0, 128  ;;  %p424_p4 = scmp.lt.u32.totalorder %s622_s30, %s731_s0 }
  0x19   : > { %p421_p5 = pnand %p420_p3, %p419_p2  ;;  %p425_p7 = scmp.lt.u32.totalorder %s423_s16, %s418_s7 }
  0x1a   : > { %p427_p13 = scmp.lt.u32.totalorder %s418_s7, %s622_s30 }
  0x1b   : > { %p422_p6 = pneg %p421_p5  ;;  %p426_p10 = por %p425_p7, %p424_p4 }
  0x1d   : > { %p428_p12 = por %p427_p13, %p426_p10 }
  0x1f   : > { %p429_p1 = pnand %p428_p12, %p422_p6 }
  0x21   : > { %432 = shalt.err (!%p429_p1)
}
  0x22   : > { %s433_s20 = scalar_lea.vmem %s624_s4, 64  ;;  %s532_s25 = smov [#allocation2]  }
  0x23   : > { %p434_p2 = scmp.ne.s32.totalorder %s624_s4, %s433_s20  ;;  %s438_s26 = sshll.u32 %s532_s25, 4  ;;  %s439_s26 = int_to_ptr.vmem [resolvable:$false] %s438_s26 }
  0x24   : > { %s440_s27 = scalar_lea.vmem %s439_s26, 128  ;;  %p441_p9 = scmp.lt.s32.totalorder %s624_s4, %s439_s26 }
  0x25   : > { %p436_p5 = pnand %p434_p2, %p420_p3  ;;  %p442_p4 = scmp.lt.s32.totalorder %s440_s27, %s433_s20 }
  0x27   : > { %p437_p11 = pneg %p436_p5  ;;  %p443_p7 = por %p442_p4, %p441_p9 }
  0x29   : > { %p444_p10 = pnand %p443_p7, %p437_p11 }
  0x2b   : > { %447 = shalt.err (!%p444_p10)
}
  0x2c   : > { %s533_s28 = smov 32   ;;  %s534_s29 = smov 2  }
  0x2d   : > { %359 = dma.hbm_to_vmem [thread:$0]  (!%p628_p0), %s622_s30, 64, %s624_s4, %s633_s6, %s533_s28, %s533_s28, %s534_s29  }
  0x2e   : > { %p159_p12 = scmp.lt.s32.totalorder %s530_s14, 3  ;;  %p740_p1 = scmp.ge.s32.totalorder %s530_s14, 1 }
  0x30   : > { %p160_p3 = pnand %p740_p1, %p159_p12 }
  0x31   : > { %s665_s3 = sand.u32 (!%p160_p3), 1, %s514_s10  }
  0x32   : > { %163 = sbr.rel (%p160_p3) target bundleno = 85 (0x55), region = 28  ;;  %s340_s7 = sshll.u32 (!%p160_p3), %s665_s3, 2 }
  0x33   : > { %s166_s8 = scalar_lea.sflag (!%p160_p3), [#allocation3], %s665_s3  ;;  %s169_s15 = scalar_lea.vmem (!%p160_p3), [#allocation2], %s340_s7 }
  0x39   : > { %501 = dma.done.wait (%p600_p8), %s166_s8, 64  }
  0x3a   : > { %503 = vsyncadd (%p600_p8), %s166_s8, 4294967232  ;;  %v205_v0 = vlaneseq  ;;  %s193_s30 = scalar_lea.vmem [#allocation5], %s340_s7  ;;  %s351_s5 = sshll.u32 %s522_s12, 6  ;;  %v200_v1 = vld [vmem:[%s169_s15] sm:$0x3] }
  0x3b   : > { %s228_s4 = sshll.u32 %s193_s30, 4  ;;  %v202_v2 = vld [vmem:[%s732_s1] sm:$0x3]  ;;  %v201_v3 = vld [vmem:[%s169_s15 + $0x2] sm:$0x3]  ;;  %s682_s19 = scalar_lea.hbm %s733_s2, %s351_s5  ;;  %s677_s4 = int_to_ptr.vmem [resolvable:$true] %s228_s4 }
  0x3c   : > { %vm207_vm0 = vcmp.lt.s32.totalorder %v205_v0, 256  ;;  %v203_v4 = vadd.f32 %v202_v2, %v200_v1  ;;  %v204_v5 = vadd.f32 %v202_v2, %v201_v3  ;;  %s212_s12 = scalar_lea.sflag [#allocation4], %s665_s3  ;;  %s448_s20 = scalar_lea.vmem %s677_s4, 64 }
  0x3d   : > { %p449_p8 = scmp.ne.s32.totalorder %s677_s4, %s448_s20  ;;  %p741_p9 = scmp.ne.s32.totalorder %s737_s22, 0 }
  0x3e   : > { %209 = vst.msk [vmem:[%s193_s30] sm:$0x3] %vm207_vm0, %v203_v4  ;;  %210 = vst.msk [vmem:[%s193_s30 + $0x2] sm:$0x3] %vm207_vm0, %v204_v5  ;;  %s535_s25 = smov [#allocation5]  }
  0x3f   : > { %p450_p11 = pnand %p449_p8, %p741_p9  ;;  %s452_s26 = sshll.u32 %s535_s25, 4  ;;  %s453_s26 = int_to_ptr.vmem [resolvable:$false] %s452_s26 }
  0x40   : > { %s454_s27 = scalar_lea.vmem %s453_s26, 128  ;;  %p455_p6 = scmp.lt.s32.totalorder %s677_s4, %s453_s26 }
  0x41   : > { %p451_p0 = pneg %p450_p11  ;;  %p456_p13 = scmp.lt.s32.totalorder %s454_s27, %s448_s20 }
  0x43   : > { %p457_p2 = por %p456_p13, %p455_p6 }
  0x45   : > { %p458_p5 = pnand %p457_p2, %p451_p0 }
  0x47   : > { %461 = shalt.err (!%p458_p5)
}
  0x48   : > { %s462_s28 = scalar_lea.hbm %s682_s19, 64  ;;  %s466_s8 = scalar_lea.hbm %s733_s2, 128 }
  0x49   : > { %p463_p4 = scmp.ne.s32.totalorder %s682_s19, %s462_s28  ;;  %p467_p12 = scmp.lt.u32.totalorder %s682_s19, %s733_s2 }
  0x4a   : > { %p468_p1 = scmp.lt.u32.totalorder %s466_s8, %s462_s28  ;;  %p470_p8 = scmp.lt.u32.totalorder %s462_s28, %s682_s19 }
  0x4b   : > { %p464_p7 = pnand %p463_p4, %p741_p9 }
  0x4c   : > { %p469_p3 = por %p468_p1, %p467_p12 }
  0x4d   : > { %p465_p10 = pneg %p464_p7 }
  0x4e   : > { %p471_p11 = por %p470_p8, %p469_p3 }
  0x50   : > { %p472_p0 = pnand %p471_p11, %p465_p10 }
  0x52   : > { %475 = shalt.err (!%p472_p0)
}
  0x53   : > { %s536_s5 = smov 32   ;;  %s537_s6 = smov 2  }
  0x54   : > { %354 = dma.vmem_to_hbm [thread:$0]  (%p741_p9), %s677_s4, 64, %s682_s19, %s212_s12, %s536_s5, %s536_s5, %s537_s6  }
  0x55 PF: > { %s243_s16 = sand.u32 1, %s510_s9   ;;  %p742_p6 = scmp.ne.s32.totalorder %s738_s24, 0 }
  0x56   : > { %p743_p13 = scmp.ge.s32.totalorder %s530_s14, 2  ;;  %s244_s21 = scalar_lea.sflag [#allocation4], %s243_s16 }
  0x58   : > { %p361_p2 = pnand %p743_p13, %p742_p6 }
  0x5a   : > { %505 = dma.done.wait (!%p361_p2), %s244_s21, 64  }
  0x5b   : > { %507 = vsyncadd (!%p361_p2), %s244_s21, 4294967232  ;;  %s18_s14 = sadd.s32 1, %s530_s14   ;;  %s744_s9 = smov %s514_s10 }
  0x5c   : > { %p15_p5 = scmp.ge.s32.totalorder %s18_s14, 4   ;;  %s745_s10 = smov %s518_s11 }
  0x5d   : > { %s746_s11 = smov %s609_s23  ;;  %s747_s12 = smov %s526_s13 }
  0x5e   : > { %s748_s13 = smov %s750_s17  ;;  %17 = sbr.rel (!%p15_p5) target bundleno = 6 (0x6), region = 76 }
  0x65   :  { %249 = vsyncpa [#allocation3], 1 }
  0x66   :  { %251 = vsyncpa [#allocation3 + $0x1], 1 }
  0x67   :  { %252 = vsyncpa [#allocation4], 1 }
  0x68   :  { %254 = vsyncpa [#allocation4 + $0x1], 1 }

</bundles_post_ra>
